<compile_context>
chip_gen: v6e
topology: v6e:2x2x1
jax: 0.10.0
libtpu: 0.0.40
codegen_flags: <defaults>
</compile_context>

<pallas_src>
import functools
import math

import jax
import jax.numpy as jnp
from jax.experimental import pallas as pl
from jax.experimental.pallas import tpu as pltpu


_SQRT_2_OVER_PI = 0.7978845608028654


# TODO(synk): PyTorch nn.GELU() defaults to the exact erf formulation; erf has
# no guaranteed Mosaic lowering, so the tanh approximation is used here
# (max abs deviation ~1e-3 vs erf-GELU).
def _gelu_tanh(x):
    return 0.5 * x * (1.0 + jnp.tanh(_SQRT_2_OVER_PI * (x + 0.044715 * x * x * x)))


def _round_up(a, b):
    return (a + b - 1) // b * b


def _vmem_budget_bytes():
    """75% of physical VMEM (v5e/v6e: ~96 MiB, v7x: ~48 MiB)."""
    try:
        cap = pltpu.get_tpu_info().vmem_capacity_bytes
    except Exception:
        cap = 64 * 1024 * 1024  # conservative fallback (v7x physical size)
    return int(cap * 0.75)


def _res_block_kernel(x_ref, g_ref, bta_ref, w1_ref, b1_ref, w2_ref, b2_ref,
                      o_ref, *, c_real, eps):
    """LayerNorm -> fc1 -> GELU -> fc2 -> +residual for one tile of tokens."""
    f32 = jnp.float32
    x = x_ref[...].astype(f32)                          # (tm, Cp)

    # --- LayerNorm, single pass over the real (un-padded) channels -----------
    # Padded lanes of x are zero, so sum(x)/c_real and sum(x*x)/c_real are the
    # true first/second moments.
    inv_c = 1.0 / c_real
    s1 = jnp.sum(x, axis=-1, keepdims=True)
    s2 = jnp.sum(x * x, axis=-1, keepdims=True)
    mean = s1 * inv_c
    var = s2 * inv_c - mean * mean
    inv_std = jax.lax.rsqrt(var + eps)
    # Padded gamma/beta lanes are zero, so padded lanes of y are exactly zero.
    y = (x - mean) * inv_std * g_ref[...].astype(f32) + bta_ref[...].astype(f32)

    # Stash the normalized activation (the residual term) in the output tile so
    # the f32 copy of y does not have to stay live across both matmuls.
    o_ref[...] = y.astype(o_ref.dtype)

    # --- proj: fc1 -> GELU -> fc2 (bf16 MXU operands, f32 accumulation) ------
    h = jnp.dot(y.astype(w1_ref.dtype), w1_ref[...],
                preferred_element_type=jnp.float32)
    h = _gelu_tanh(h + b1_ref[...].astype(f32))
    z = jnp.dot(h.astype(w2_ref.dtype), w2_ref[...],
                preferred_element_type=jnp.float32)
    z = z + b2_ref[...].astype(f32)

    # --- residual from the *normalized* activation ----------------------------
    o_ref[...] = (o_ref[...].astype(f32) + z).astype(o_ref.dtype)


def prepare_params(gamma, beta, w1, b1, w2, b2, *, compute_dtype=jnp.bfloat16):
    """One-time parameter prep: lane-dense (multiple-of-128) channel padding and
    conversion of the matmul weights to the MXU compute dtype.  Call once at
    setup so the per-forward path does no weight padding / casting.
    w1, w2 are (in, out) layout; gamma/beta/b1/b2 are (C,)."""
    c = gamma.shape[0]
    c_pad = _round_up(c, 128)
    dc = c_pad - c
    f32 = jnp.float32
    g = jnp.pad(gamma.astype(f32).reshape(1, c), ((0, 0), (0, dc)))
    bt = jnp.pad(beta.astype(f32).reshape(1, c), ((0, 0), (0, dc)))
    b1p = jnp.pad(b1.astype(f32).reshape(1, c), ((0, 0), (0, dc)))
    b2p = jnp.pad(b2.astype(f32).reshape(1, c), ((0, 0), (0, dc)))
    w1p = jnp.pad(w1, ((0, dc), (0, dc))).astype(compute_dtype)
    w2p = jnp.pad(w2, ((0, dc), (0, dc))).astype(compute_dtype)
    return g, bt, w1p, b1p, w2p, b2p


def simple_res_block(x, params, *, eps=1e-5, tile_m=512):
    """x: (..., C); params: output of prepare_params."""
    gamma2, beta2, w1p, b1p, w2p, b2p = params
    c = x.shape[-1]
    c_pad = w1p.shape[-1]
    dc = c_pad - c
    lead = x.shape[:-1]
    x2 = x.reshape(-1, c)
    m = x2.shape[0]

    # Lane-dense channel padding of the activation only when needed.
    if dc:
        x2 = jnp.pad(x2, ((0, 0), (0, dc)))

    itemsize = jnp.dtype(x.dtype).itemsize
    w_itemsize = jnp.dtype(w1p.dtype).itemsize
    budget = _vmem_budget_bytes()
    # Resident (single-buffered) weights + biases.
    resident = 2 * c_pad * c_pad * w_itemsize + 4 * c_pad * 4

    # Token tile: large (amortize per-step overhead), >=2 grid steps when
    # possible (v7x megacore), and within the VMEM budget.
    tm = _round_up(min(tile_m, _round_up(m, 8)), 8)
    if m > 16 and pl.cdiv(m, tm) < 2:
        tm = _round_up(pl.cdiv(m, 2), 8)

    def _tile_bytes(t):
        # double-buffered in/out tiles + f32 temporaries headroom
        return 2 * t * c_pad * itemsize * 2 + 6 * t * c_pad * 4

    while tm > 8 and resident + _tile_bytes(tm) > budget:
        tm = max(8, _round_up(tm // 2, 8))

    grid = (pl.cdiv(m, tm),)

    # Constant-index params: single-buffered so they are resident once in VMEM.
    def const_spec(shape):
        return pl.BlockSpec(shape, lambda i: (0,) * len(shape),
                            pipeline_mode=pl.Buffered(1))

    cost = pl.CostEstimate(
        flops=4 * m * c_pad * c_pad + 10 * m * c_pad,
        transcendentals=m * c_pad + 2 * m,
        bytes_accessed=(2 * m * c_pad * itemsize
                        + 2 * c_pad * c_pad * w_itemsize
                        + 4 * c_pad * 4),
    )

    kernel = functools.partial(_res_block_kernel, c_real=c, eps=eps)

    out = pl.pallas_call(
        kernel,
        out_shape=jax.ShapeDtypeStruct((m, c_pad), x.dtype),
        grid_spec=pltpu.PrefetchScalarGridSpec(
            num_scalar_prefetch=0,
            grid=grid,
            in_specs=[
                pl.BlockSpec((tm, c_pad), lambda i: (i, 0)),   # x tile (pipelined)
                const_spec((1, c_pad)),                        # gamma
                const_spec((1, c_pad)),                        # beta
                const_spec((c_pad, c_pad)),                    # W1 (bf16)
                const_spec((1, c_pad)),                        # b1
                const_spec((c_pad, c_pad)),                    # W2 (bf16)
                const_spec((1, c_pad)),                        # b2
            ],
            out_specs=pl.BlockSpec((tm, c_pad), lambda i: (i, 0)),
        ),
        compiler_params=pltpu.CompilerParams(
            dimension_semantics=("parallel",),
            vmem_limit_bytes=budget,
        ),
        cost_estimate=cost,
    )(x2, gamma2, beta2, w1p, b1p, w2p, b2p)

    if dc:
        out = out[:, :c]
    return out.reshape(*lead, c)


def _reference(x, gamma, beta, w1, b1, w2, b2, eps=1e-5,
               compute_dtype=jnp.bfloat16):
    """Pure-JAX reference mirroring the kernel's dtype path
    (f32 LN/GELU, bf16 matmul operands, f32 accumulation, tanh-GELU)."""
    f32 = jnp.float32
    xf = x.astype(f32)
    mean = jnp.mean(xf, axis=-1, keepdims=True)
    var = jnp.mean(jnp.square(xf - mean), axis=-1, keepdims=True)
    y = (xf - mean) * jax.lax.rsqrt(var + eps) * gamma.astype(f32) + beta.astype(f32)
    h = jnp.dot(y.astype(compute_dtype), w1.astype(compute_dtype),
                preferred_element_type=f32) + b1.astype(f32)
    h = _gelu_tanh(h)
    z = jnp.dot(h.astype(compute_dtype), w2.astype(compute_dtype),
                preferred_element_type=f32) + b2.astype(f32)
    return (y + z).astype(x.dtype)


def init_params(key, channels, dtype=jnp.float32):
    """Deterministic synthetic params (nn.Linear-style uniform; LN gamma~1, beta~0)."""
    ks = jax.random.split(key, 6)
    bound = 1.0 / math.sqrt(channels)
    gamma = jnp.ones((channels,), dtype) + 0.05 * jax.random.normal(ks[0], (channels,), dtype)
    beta = 0.05 * jax.random.normal(ks[1], (channels,), dtype)
    # Linear weights stored already transposed to (in, out) for the kernel.
    w1 = jax.random.uniform(ks[2], (channels, channels), dtype, -bound, bound)
    b1 = jax.random.uniform(ks[3], (channels,), dtype, -bound, bound)
    w2 = jax.random.uniform(ks[4], (channels, channels), dtype, -bound, bound)
    b2 = jax.random.uniform(ks[5], (channels,), dtype, -bound, bound)
    return gamma, beta, w1, b1, w2, b2


if __name__ == "__main__":
    key = jax.random.PRNGKey(0)
    kx, kp, kx2, kp2 = jax.random.split(key, 4)

    block = jax.jit(functools.partial(simple_res_block, tile_m=512))

    # Check 1: lane-dense channel count, small token count (single grid step).
    batch, seq, channels = 2, 8, 128
    x = jax.random.normal(kx, (batch, seq, channels), jnp.float32)
    raw = init_params(kp, channels)
    params = prepare_params(*raw)
    y = block(x, params)
    jax.block_until_ready(y)
    y_ref = _reference(x, *raw)
    assert y.shape == (batch, seq, channels)
    err = float(jnp.max(jnp.abs(y - y_ref)))
    assert err < 1e-2, err

    # Check 2: channels not a multiple of 128 and odd token count, exercising
    # lane padding and the ragged (partial) last token block.
    b_s, s_s, c_s = 3, 7, 96
    x_b = jax.random.normal(kx2, (b_s, s_s, c_s), jnp.float32)
    raw_b = init_params(kp2, c_s)
    params_b = prepare_params(*raw_b)
    y_b = block(x_b, params_b)
    jax.block_until_ready(y_b)
    y_b_ref = _reference(x_b, *raw_b)
    assert y_b.shape == (b_s, s_s, c_s)
    err_b = float(jnp.max(jnp.abs(y_b - y_b_ref)))
    assert err_b < 1e-2, err_b

    print("KERNEL_OK")
</pallas_src>

<mosaic_0001>
module attributes {stable_mosaic.version = 11 : i64} {
  func.func @_res_block_kernel(%arg0: i32, %arg1: memref<16x128xf32, #tpu.memory_space<vmem>>, %arg2: memref<1x128xf32, #tpu.memory_space<vmem>>, %arg3: memref<1x128xf32, #tpu.memory_space<vmem>>, %arg4: memref<128x128xbf16, #tpu.memory_space<vmem>>, %arg5: memref<1x128xf32, #tpu.memory_space<vmem>>, %arg6: memref<128x128xbf16, #tpu.memory_space<vmem>>, %arg7: memref<1x128xf32, #tpu.memory_space<vmem>>, %arg8: memref<16x128xf32, #tpu.memory_space<vmem>>) attributes {dimension_semantics = [#tpu.dimension_semantics<parallel>], iteration_bounds = array<i64: 1>, scalar_prefetch = 0 : i64, scratch_operands = 0 : i64, tpu.core_type = #tpu.core_type<tc>, window_params = [{transform_indices = @transform_0, window_bounds = array<i64: 16, 128>}, {pipeline_mode = #tpu.pipeline_mode<synchronous>, transform_indices = @transform_1, window_bounds = array<i64: 1, 128>}, {pipeline_mode = #tpu.pipeline_mode<synchronous>, transform_indices = @transform_2, window_bounds = array<i64: 1, 128>}, {pipeline_mode = #tpu.pipeline_mode<synchronous>, transform_indices = @transform_3, window_bounds = array<i64: 128, 128>}, {pipeline_mode = #tpu.pipeline_mode<synchronous>, transform_indices = @transform_4, window_bounds = array<i64: 1, 128>}, {pipeline_mode = #tpu.pipeline_mode<synchronous>, transform_indices = @transform_5, window_bounds = array<i64: 128, 128>}, {pipeline_mode = #tpu.pipeline_mode<synchronous>, transform_indices = @transform_6, window_bounds = array<i64: 1, 128>}, {transform_indices = @transform_7, window_bounds = array<i64: 16, 128>}]} {
    %c0 = arith.constant 0 : index
    %c0_0 = arith.constant 0 : index
    %0 = vector.load %arg1[%c0, %c0_0] : memref<16x128xf32, #tpu.memory_space<vmem>>, vector<16x128xf32>
    %cst = arith.constant dense<0.000000e+00> : vector<16xf32>
    %1 = vector.multi_reduction <add>, %0, %cst [1] : vector<16x128xf32> to vector<16xf32>
    %2 = vector.shape_cast %1 : vector<16xf32> to vector<16x1xf32>
    %3 = arith.mulf %0, %0 : vector<16x128xf32>
    %cst_1 = arith.constant dense<0.000000e+00> : vector<16xf32>
    %4 = vector.multi_reduction <add>, %3, %cst_1 [1] : vector<16x128xf32> to vector<16xf32>
    %5 = vector.shape_cast %4 : vector<16xf32> to vector<16x1xf32>
    %cst_2 = arith.constant 7.812500e-03 : f32
    %6 = vector.broadcast %cst_2 : f32 to vector<16x1xf32>
    %7 = arith.mulf %2, %6 : vector<16x1xf32>
    %cst_3 = arith.constant 7.812500e-03 : f32
    %8 = vector.broadcast %cst_3 : f32 to vector<16x1xf32>
    %9 = arith.mulf %5, %8 : vector<16x1xf32>
    %10 = arith.mulf %7, %7 : vector<16x1xf32>
    %11 = arith.subf %9, %10 : vector<16x1xf32>
    %cst_4 = arith.constant 9.99999974E-6 : f32
    %12 = vector.broadcast %cst_4 : f32 to vector<16x1xf32>
    %13 = arith.addf %11, %12 : vector<16x1xf32>
    %14 = math.rsqrt %13 : vector<16x1xf32>
    %15 = vector.broadcast %7 : vector<16x1xf32> to vector<16x128xf32>
    %16 = arith.subf %0, %15 : vector<16x128xf32>
    %17 = vector.broadcast %14 : vector<16x1xf32> to vector<16x128xf32>
    %18 = arith.mulf %16, %17 : vector<16x128xf32>
    %c0_5 = arith.constant 0 : index
    %c0_6 = arith.constant 0 : index
    %19 = vector.load %arg2[%c0_5, %c0_6] : memref<1x128xf32, #tpu.memory_space<vmem>>, vector<1x128xf32>
    %20 = vector.broadcast %19 : vector<1x128xf32> to vector<16x128xf32>
    %21 = arith.mulf %18, %20 : vector<16x128xf32>
    %c0_7 = arith.constant 0 : index
    %c0_8 = arith.constant 0 : index
    %22 = vector.load %arg3[%c0_7, %c0_8] : memref<1x128xf32, #tpu.memory_space<vmem>>, vector<1x128xf32>
    %23 = vector.broadcast %22 : vector<1x128xf32> to vector<16x128xf32>
    %24 = arith.addf %21, %23 : vector<16x128xf32>
    %c0_9 = arith.constant 0 : index
    %c0_10 = arith.constant 0 : index
    %25 = vector.load %arg8[%c0_9, %c0_10] : memref<16x128xf32, #tpu.memory_space<vmem>>, vector<16x128xf32>
    tpu.vector_store %arg8[%c0_9, %c0_10], %24 {strides = array<i32>} : memref<16x128xf32, #tpu.memory_space<vmem>>, vector<16x128xf32>,
    %26 = arith.truncf %24 : vector<16x128xf32> to vector<16x128xbf16>
    %c0_11 = arith.constant 0 : index
    %c0_12 = arith.constant 0 : index
    %27 = vector.load %arg4[%c0_11, %c0_12] : memref<128x128xbf16, #tpu.memory_space<vmem>>, vector<128x128xbf16>
    %cst_13 = arith.constant dense<0.000000e+00> : vector<16x128xf32>
    %28 = tpu.matmul %26, %27, %cst_13 {dimension_numbers = #tpu.dot_dimension_numbers<[1], [0], [0], [1], [0, 0, 1, 1], [], []>} : vector<16x128xbf16>, vector<128x128xbf16>, vector<16x128xf32> -> vector<16x128xf32>
    %c0_14 = arith.constant 0 : index
    %c0_15 = arith.constant 0 : index
    %29 = vector.load %arg5[%c0_14, %c0_15] : memref<1x128xf32, #tpu.memory_space<vmem>>, vector<1x128xf32>
    %30 = vector.broadcast %29 : vector<1x128xf32> to vector<16x128xf32>
    %31 = arith.addf %28, %30 : vector<16x128xf32>
    %cst_16 = arith.constant 5.000000e-01 : f32
    %32 = vector.broadcast %cst_16 : f32 to vector<16x128xf32>
    %33 = arith.mulf %32, %31 : vector<16x128xf32>
    %cst_17 = arith.constant 4.471500e-02 : f32
    %34 = vector.broadcast %cst_17 : f32 to vector<16x128xf32>
    %35 = arith.mulf %34, %31 : vector<16x128xf32>
    %36 = arith.mulf %35, %31 : vector<16x128xf32>
    %37 = arith.mulf %36, %31 : vector<16x128xf32>
    %38 = arith.addf %31, %37 : vector<16x128xf32>
    %cst_18 = arith.constant 0.797884583 : f32
    %39 = vector.broadcast %cst_18 : f32 to vector<16x128xf32>
    %40 = arith.mulf %39, %38 : vector<16x128xf32>
    %41 = math.tanh %40 : vector<16x128xf32>
    %cst_19 = arith.constant 1.000000e+00 : f32
    %42 = vector.broadcast %cst_19 : f32 to vector<16x128xf32>
    %43 = arith.addf %42, %41 : vector<16x128xf32>
    %44 = arith.mulf %33, %43 : vector<16x128xf32>
    %45 = arith.truncf %44 : vector<16x128xf32> to vector<16x128xbf16>
    %c0_20 = arith.constant 0 : index
    %c0_21 = arith.constant 0 : index
    %46 = vector.load %arg6[%c0_20, %c0_21] : memref<128x128xbf16, #tpu.memory_space<vmem>>, vector<128x128xbf16>
    %cst_22 = arith.constant dense<0.000000e+00> : vector<16x128xf32>
    %47 = tpu.matmul %45, %46, %cst_22 {dimension_numbers = #tpu.dot_dimension_numbers<[1], [0], [0], [1], [0, 0, 1, 1], [], []>} : vector<16x128xbf16>, vector<128x128xbf16>, vector<16x128xf32> -> vector<16x128xf32>
    %c0_23 = arith.constant 0 : index
    %c0_24 = arith.constant 0 : index
    %48 = vector.load %arg7[%c0_23, %c0_24] : memref<1x128xf32, #tpu.memory_space<vmem>>, vector<1x128xf32>
    %49 = vector.broadcast %48 : vector<1x128xf32> to vector<16x128xf32>
    %50 = arith.addf %47, %49 : vector<16x128xf32>
    %c0_25 = arith.constant 0 : index
    %c0_26 = arith.constant 0 : index
    %51 = vector.load %arg8[%c0_25, %c0_26] : memref<16x128xf32, #tpu.memory_space<vmem>>, vector<16x128xf32>
    %52 = arith.addf %51, %50 : vector<16x128xf32>
    %c0_27 = arith.constant 0 : index
    %c0_28 = arith.constant 0 : index
    %53 = vector.load %arg8[%c0_27, %c0_28] : memref<16x128xf32, #tpu.memory_space<vmem>>, vector<16x128xf32>
    tpu.vector_store %arg8[%c0_27, %c0_28], %52 {strides = array<i32>} : memref<16x128xf32, #tpu.memory_space<vmem>>, vector<16x128xf32>,
    return
  }
  func.func @transform_0(%arg0: i32) -> (i32, i32) {
    %c0_i32 = arith.constant 0 : i32
    %c0_i32_0 = arith.constant 0 : i32
    return %arg0, %c0_i32 : i32, i32
  }
  func.func @transform_1(%arg0: i32) -> (i32, i32) {
    %c0_i32 = arith.constant 0 : i32
    %c0_i32_0 = arith.constant 0 : i32
    %c0_i32_1 = arith.constant 0 : i32
    return %c0_i32, %c0_i32_0 : i32, i32
  }
  func.func @transform_2(%arg0: i32) -> (i32, i32) {
    %c0_i32 = arith.constant 0 : i32
    %c0_i32_0 = arith.constant 0 : i32
    %c0_i32_1 = arith.constant 0 : i32
    return %c0_i32, %c0_i32_0 : i32, i32
  }
  func.func @transform_3(%arg0: i32) -> (i32, i32) {
    %c0_i32 = arith.constant 0 : i32
    %c0_i32_0 = arith.constant 0 : i32
    %c0_i32_1 = arith.constant 0 : i32
    return %c0_i32, %c0_i32_0 : i32, i32
  }
  func.func @transform_4(%arg0: i32) -> (i32, i32) {
    %c0_i32 = arith.constant 0 : i32
    %c0_i32_0 = arith.constant 0 : i32
    %c0_i32_1 = arith.constant 0 : i32
    return %c0_i32, %c0_i32_0 : i32, i32
  }
  func.func @transform_5(%arg0: i32) -> (i32, i32) {
    %c0_i32 = arith.constant 0 : i32
    %c0_i32_0 = arith.constant 0 : i32
    %c0_i32_1 = arith.constant 0 : i32
    return %c0_i32, %c0_i32_0 : i32, i32
  }
  func.func @transform_6(%arg0: i32) -> (i32, i32) {
    %c0_i32 = arith.constant 0 : i32
    %c0_i32_0 = arith.constant 0 : i32
    %c0_i32_1 = arith.constant 0 : i32
    return %c0_i32, %c0_i32_0 : i32, i32
  }
  func.func @transform_7(%arg0: i32) -> (i32, i32) {
    %c0_i32 = arith.constant 0 : i32
    %c0_i32_0 = arith.constant 0 : i32
    return %arg0, %c0_i32 : i32, i32
  }
}

</mosaic_0001>

<bundles_post_ra>
// kernel: simple_res_block.1
= control target key start
LH: loop header
LB: loop body
LE: loop exit
PB: predicated region body
PF: predicated region fallthrough
CT: control target
= control target key end

     0   :  { %12 = vsyncpa [#allocation3], 0  ;;  %s685_s0 = inlined_call_operand.hbm [shape: f32[16,128], index: 0, kind: input, shape index: {}]   ;;  %s686_s1 = inlined_call_operand.vmem [shape: f32[1,128], index: 1, kind: input, shape index: {}]   ;;  %s687_s2 = inlined_call_operand.vmem [shape: f32[1,128], index: 2, kind: input, shape index: {}]   ;;  %s688_s3 = inlined_call_operand.hbm [shape: bf16[128,128], index: 3, kind: input, shape index: {}]   ;;  %s689_s4 = inlined_call_operand.vmem [shape: f32[1,128], index: 4, kind: input, shape index: {}]   ;;  %s690_s5 = inlined_call_operand.hbm [shape: bf16[128,128], index: 5, kind: input, shape index: {}]   ;;  %s691_s6 = inlined_call_operand.vmem [shape: f32[1,128], index: 6, kind: input, shape index: {}]   ;;  %s692_s7 = inlined_call_operand.hbm [shape: f32[16,128], index: 7, kind: output, shape index: {}]  }
   0x1   :  { %13 = vsyncpa [#allocation6], 0 }
   0x2   :  { %14 = vsyncpa [#allocation4], 0  ;;  %s583_s24 = smov [#allocation5]  }
   0x3   :  { %s36_s25 = sshll.u32 %s583_s24, 4  ;;  %s37_s25 = int_to_ptr.vmem [resolvable:$true] %s36_s25 }
   0x4   :  { %s505_s26 = scalar_lea.vmem %s37_s25, 1024  ;;  %p510_p1 = scmp.lt.s32.totalorder %s37_s25, %s37_s25 }
   0x5   :  { %p506_p0 = scmp.ne.s32.totalorder %s37_s25, %s505_s26  ;;  %p511_p2 = scmp.lt.s32.totalorder %s505_s26, %s505_s26 }
   0x7   :  { %p512_p3 = por %p511_p2, %p510_p1 }
   0x9   :  { %p513_p4 = pnand %p512_p3, %p506_p0 }
   0xb   :  { %516 = shalt.err (!%p513_p4)
}
   0xc   :  { %s584_s27 = smov 64   ;;  %s585_s28 = smov 4  }
   0xd   :  { %42 = dma.hbm_to_vmem [thread:$0]  %s688_s3, 1024, %s37_s25, [#allocation6], %s584_s27, %s584_s27, %s585_s28  }
   0xe   :  { %s586_s8 = smov [#allocation2]  }
   0xf   :  { %s20_s9 = sshll.u32 %s586_s8, 4  ;;  %s21_s9 = int_to_ptr.vmem [resolvable:$true] %s20_s9 }
  0x10   :  { %s525_s10 = scalar_lea.vmem %s21_s9, 256  ;;  %p530_p6 = scmp.lt.s32.totalorder %s21_s9, %s21_s9 }
  0x11   :  { %p526_p5 = scmp.ne.s32.totalorder %s21_s9, %s525_s10  ;;  %p531_p7 = scmp.lt.s32.totalorder %s525_s10, %s525_s10 }
  0x13   :  { %p532_p8 = por %p531_p7, %p530_p6 }
  0x15   :  { %p533_p9 = pnand %p532_p8, %p526_p5 }
  0x17   :  { %536 = shalt.err (!%p533_p9)
}
  0x18   :  { %s587_s11 = smov 128   ;;  %s588_s12 = smov 8  }
  0x19   :  { %26 = dma.hbm_to_vmem [thread:$0]  %s685_s0, 256, %s21_s9, [#allocation3], %s587_s11, %s587_s11, %s588_s12  }
  0x1a   :  { %s589_s3 = smov [#allocation7]  }
  0x1b   :  { %s50_s15 = sshll.u32 %s589_s3, 4  ;;  %s51_s15 = int_to_ptr.vmem [resolvable:$true] %s50_s15 }
  0x1c   :  { %s545_s16 = scalar_lea.vmem %s51_s15, 1024  ;;  %p550_p11 = scmp.lt.s32.totalorder %s51_s15, %s51_s15 }
  0x1d   :  { %p546_p10 = scmp.ne.s32.totalorder %s51_s15, %s545_s16  ;;  %p551_p12 = scmp.lt.s32.totalorder %s545_s16, %s545_s16 }
  0x1f   :  { %p552_p13 = por %p551_p12, %p550_p11 }
  0x21   :  { %p553_p0 = pnand %p552_p13, %p546_p10 }
  0x23   :  { %556 = shalt.err (!%p553_p0)
}
  0x24   :  { %56 = dma.hbm_to_vmem [thread:$0]  %s690_s5, 1024, %s51_s15, [#allocation6], %s584_s27, %s584_s27, %s585_s28  }
  0x25   :  { %577 = dma.done.wait [#allocation3], 256  }
  0x26   :  { %578 = vsyncadd [#allocation3], 4294967040 }
  0x27   :  { %579 = dma.done.wait [#allocation6], 2048  }
  0x28   :  { %580 = vsyncadd [#allocation6], 4294965248  ;;  %v69_v0 = vld [vmem:[#allocation2] sm:$0xff]  ;;  %v70_v1 = vld [vmem:[#allocation2 + $0x8] sm:$0xff]  ;;  %v590_v5 = vmov 0.0   ;;  %vm591_vm0 = vmmov 0  }
  0x29   :  { %71 = vadd.xlane.f32.xlu0 %v69_v0  ;;  %v75_v2 = vmul.f32 %v69_v0, %v69_v0  ;;  %v76_v3 = vmul.f32 %v70_v1, %v70_v1  ;;  %v473_v4 = vld [vmem:[#allocation5 + $0x38] sm:$0xff]   ;;  %423 = vmatprep.subr.bf16.mxu0 %v590_v5  ;;  %v474_v6 = vld [vmem:[#allocation5 + $0x30] sm:$0xff]   ;;  %v475_v7 = vld [vmem:[#allocation5 + $0x28] sm:$0xff]   ;;  %s592_s22 = smov [#allocation8]  }
  0x2a   :  { %443 = vmatprep.subr.bf16.mxu1 %v590_v5  ;;  %424 = vmatpush3.bf16.msra.mxu0 %v473_v4  ;;  %v476_v8 = vld [vmem:[#allocation5 + $0x20] sm:$0xff]   ;;  %v477_v9 = vld [vmem:[#allocation5 + $0x18] sm:$0xff]   ;;  %v478_v10 = vld [vmem:[#allocation5 + $0x10] sm:$0xff]   ;;  %s372_s23 = sshll.u32 %s592_s22, 4  ;;  %s373_s23 = int_to_ptr.vmem [resolvable:$true] %s372_s23 }
  0x2b   :  { %77 = vadd.xlane.f32.xlu1 %v75_v2  ;;  %425 = vmatprep.subr.bf16.mxu0 %v590_v5  ;;  %v479_v11 = vld [vmem:[#allocation5 + $0x8] sm:$0xff]   ;;  %v480_v12 = vld [vmem:[#allocation5] sm:$0xff]   ;;  %v385_v30 = vld [vmem:[%s686_s1] ss:$0 sm:$0xff]  ;;  %s557_s24 = scalar_lea.vmem %s373_s23, 256  ;;  %p562_p2 = scmp.lt.s32.totalorder %s373_s23, %s373_s23 }
  0x2c   :  { %439 = vmatprep.mubr.msk.bf16.mxu0 %vm591_vm0, %v590_v5  ;;  %459 = vmatprep.mubr.msk.bf16.mxu1 %vm591_vm0, %v590_v5  ;;  %v386_v35 = vld [vmem:[%s687_s2] ss:$0 sm:$0xff]  ;;  %v481_v40 = vld [vmem:[#allocation7 + $0x38] sm:$0xff]   ;;  %v483_v42 = vld [vmem:[#allocation7 + $0x28] sm:$0xff]   ;;  %p558_p1 = scmp.ne.s32.totalorder %s373_s23, %s557_s24  ;;  %p563_p3 = scmp.lt.s32.totalorder %s557_s24, %s557_s24 }
  0x2d   :  { %73 = vadd.xlane.f32.xlu0 %v70_v1  ;;  %444 = vmatpush3.bf16.msra.mxu1 %v481_v40  ;;  %v482_v41 = vld [vmem:[#allocation7 + $0x30] sm:$0xff]   ;;  %v484_v43 = vld [vmem:[#allocation7 + $0x20] sm:$0xff]   ;;  %v485_v44 = vld [vmem:[#allocation7 + $0x18] sm:$0xff]  }
  0x2e   :  { %426 = vmatpush3.bf16.msra.mxu0 %v474_v6  ;;  %445 = vmatprep.subr.bf16.mxu1 %v590_v5  ;;  %v486_v45 = vld [vmem:[#allocation7 + $0x10] sm:$0xff]   ;;  %v487_v46 = vld [vmem:[#allocation7 + $0x8] sm:$0xff]   ;;  %v488_v47 = vld [vmem:[#allocation7] sm:$0xff]   ;;  %p564_p4 = por %p563_p3, %p562_p2 }
  0x2f   :  { %79 = vadd.xlane.f32.xlu1 %v76_v3  ;;  %427 = vmatprep.subr.bf16.mxu0 %v590_v5  ;;  %v387_v48 = vld [vmem:[%s689_s4] ss:$0 sm:$0xff] }
  0x30   :  { %p565_p5 = pnand %p564_p4, %p558_p1 }
  0x31   :  { %446 = vmatpush3.bf16.msra.mxu1 %v482_v41 }
  0x32   :  { %428 = vmatpush3.bf16.msra.mxu0 %v475_v7  ;;  %447 = vmatprep.subr.bf16.mxu1 %v590_v5 }
  0x33   :  { %429 = vmatprep.subr.bf16.mxu0 %v590_v5 }
  0x35   :  { %448 = vmatpush3.bf16.msra.mxu1 %v483_v42 }
  0x36   :  { %430 = vmatpush3.bf16.msra.mxu0 %v476_v8  ;;  %449 = vmatprep.subr.bf16.mxu1 %v590_v5 }
  0x37   :  { %431 = vmatprep.subr.bf16.mxu0 %v590_v5 }
  0x39   :  { %450 = vmatpush3.bf16.msra.mxu1 %v484_v43 }
  0x3a   :  { %432 = vmatpush3.bf16.msra.mxu0 %v477_v9  ;;  %451 = vmatprep.subr.bf16.mxu1 %v590_v5 }
  0x3b   :  { %433 = vmatprep.subr.bf16.mxu0 %v590_v5 }
  0x3d   :  { %452 = vmatpush3.bf16.msra.mxu1 %v485_v44 }
  0x3e   :  { %434 = vmatpush3.bf16.msra.mxu0 %v478_v10  ;;  %453 = vmatprep.subr.bf16.mxu1 %v590_v5  ;;  %v396_v10 = vld [vmem:[%s691_s6] ss:$0 sm:$0xff] }
  0x3f   :  { %435 = vmatprep.subr.bf16.mxu0 %v590_v5 }
  0x41   :  { %454 = vmatpush3.bf16.msra.mxu1 %v486_v45 }
  0x42   :  { %436 = vmatpush3.bf16.msra.mxu0 %v479_v11  ;;  %455 = vmatprep.subr.bf16.mxu1 %v590_v5 }
  0x43   :  { %437 = vmatprep.subr.bf16.mxu0 %v590_v5 }
  0x45   :  { %456 = vmatpush3.bf16.msra.mxu1 %v487_v46 }
  0x46   :  { %438 = vmatpush3.bf16.msra.mxu0 %v480_v12  ;;  %457 = vmatprep.subr.bf16.mxu1 %v590_v5 }
  0x49   :  { %458 = vmatpush3.bf16.msra.mxu1 %v488_v47 }
  0xb2   :  { %v72_v13 = vpop.xlane.xlu0 %71 }
  0xb3   :  { %v81_v14 = vmul.f32 0.0078125, %v72_v13 }
  0xb4   :  { %v78_v15 = vpop.xlane.xlu1 %77 }
  0xb5   :  { %v85_v16 = vmul.f32 %v81_v14, %v81_v14  ;;  %v83_v17 = vmul.f32 0.0078125, %v78_v15  ;;  %v93_v27 = vsub.f32 %v69_v0, %v81_v14 }
  0xb6   :  { %v74_v18 = vpop.xlane.xlu0 %73 }
  0xb7   :  { %v87_v19 = vsub.f32 %v83_v17, %v85_v16  ;;  %v82_v20 = vmul.f32 0.0078125, %v74_v18 }
  0xb8   :  { %v80_v21 = vpop.xlane.xlu1 %79 }
  0xb9   :  { %v89_v22 = vadd.f32 1e-05, %v87_v19  ;;  %v86_v23 = vmul.f32 %v82_v20, %v82_v20  ;;  %v84_v24 = vmul.f32 0.0078125, %v80_v21  ;;  %v94_v31 = vsub.f32 %v70_v1, %v82_v20 }
  0xbb   :  { %489 = vrsqrt.f32 %v89_v22  ;;  %v88_v25 = vsub.f32 %v84_v24, %v86_v23 }
  0xbd   :  { %v90_v26 = vadd.f32 1e-05, %v88_v25 }
  0xbf   :  { %491 = vrsqrt.f32 %v90_v26 }
  0xc8   :  { %v490_v28 = vpop.eup %489 }
  0xc9   :  { %v95_v29 = vmul.f32 %v490_v28, %v93_v27 }
  0xcb   :  { %v104_v34 = vmul.f32 %v385_v30, %v95_v29 }
  0xcc   :  { %v492_v32 = vpop.eup %491 }
  0xcd   :  { %v96_v33 = vmul.f32 %v492_v32, %v94_v31  ;;  %v113_v37 = vadd.f32 %v386_v35, %v104_v34 }
  0xcf   :  { %v105_v36 = vmul.f32 %v385_v30, %v96_v33 }
  0xd1   :  { %v662_v38 = vadd.f32 %v386_v35, %v105_v36 }
  0xd3   :  { %v117_v39 = vpack.c.bf16 %v662_v38, %v113_v37 }
  0xd5   :  { %440 = vmatmul.mubr.bf16.vlgmr.msra.gmra.mxu0 %v117_v39 }
 0x195   :  { %v223_v49 = vpop.f32.mrf.mxu0 }
 0x196   :  { %v224_v50 = vadd.f32 %v387_v48, %v223_v49 }
 0x197   :  { %v441_v51 = vpop.f32.mrf.mxu0 }
 0x198   :  { %v232_v52 = vmul.f32 0.044715, %v224_v50  ;;  %v230_v4 = vmul.f32 0.5, %v224_v50 }
 0x199   :  { %v226_v53 = vpop.f32.mrf.mxu0 }
 0x19a   :  { %v234_v54 = vmul.f32 %v232_v52, %v224_v50  ;;  %v227_v55 = vadd.f32 %v387_v48, %v226_v53 }
 0x19b   :  { %v442_v56 = vpop.f32.mrf.mxu0 }
 0x19c   :  { %v236_v57 = vmul.f32 %v234_v54, %v224_v50  ;;  %v233_v58 = vmul.f32 0.044715, %v227_v55  ;;  %v231_v5 = vmul.f32 0.5, %v227_v55 }
 0x19e   :  { %v235_v59 = vmul.f32 %v233_v58, %v227_v55  ;;  %v238_v60 = vadd.f32 %v236_v57, %v224_v50 }
 0x1a0   :  { %v237_v61 = vmul.f32 %v235_v59, %v227_v55  ;;  %v240_v62 = vmul.f32 0.7978846, %v238_v60 }
 0x1a2   :  { %v239_v63 = vadd.f32 %v237_v61, %v227_v55  ;;  %493 = vtanh.f32 %v240_v62 }
 0x1a4   :  { %v241_v0 = vmul.f32 0.7978846, %v239_v63 }
 0x1a6   :  { %495 = vtanh.f32 %v241_v0 }
 0x1af   :  { %v494_v1 = vpop.eup %493 }
 0x1b0   :  { %v244_v2 = vadd.f32 1.0, %v494_v1 }
 0x1b2   :  { %v246_v7 = vmul.f32 %v244_v2, %v230_v4 }
 0x1b3   :  { %v496_v3 = vpop.eup %495 }
 0x1b4   :  { %v245_v6 = vadd.f32 1.0, %v496_v3 }
 0x1b6   :  { %v247_v8 = vmul.f32 %v245_v6, %v231_v5 }
 0x1b8   :  { %v248_v9 = vpack.c.bf16 %v247_v8, %v246_v7 }
 0x1ba   :  { %460 = vmatmul.mubr.bf16.vlgmr.msra.gmra.mxu1 %v248_v9 }
 0x27a   :  { %v354_v11 = vpop.f32.mrf.mxu1 }
 0x27b   :  { %v355_v12 = vadd.f32 %v396_v10, %v354_v11 }
 0x27c   :  { %v461_v13 = vpop.f32.mrf.mxu1 }
 0x27d   :  { %v363_v14 = vadd.f32 %v355_v12, %v113_v37 }
 0x27e   :  { %v357_v15 = vpop.f32.mrf.mxu1 }
 0x27f   :  { %365 = vst [vmem:[#allocation8] sm:$0xff] %v363_v14  ;;  %v358_v16 = vadd.f32 %v396_v10, %v357_v15 }
 0x280   :  { %v462_v17 = vpop.f32.mrf.mxu1 }
 0x281   :  { %v364_v18 = vadd.f32 %v358_v16, %v662_v38 }
 0x283   :  { %366 = vst [vmem:[#allocation8 + $0x8] sm:$0xff] %v364_v18 }
 0x284   :  { %568 = shalt.err (!%p565_p5)
}
 0x285   :  { %378 = dma.vmem_to_hbm [thread:$0]  %s373_s23, 256, %s692_s7, [#allocation4], %s587_s11, %s587_s11, %s588_s12  }
 0x286   :  { %581 = dma.done.wait [#allocation4], 256  }
 0x287   :  { %582 = vsyncadd [#allocation4], 4294967040 }
 0x288   :  { %382 = vsyncpa [#allocation3], 1 }
 0x289   :  { %383 = vsyncpa [#allocation6], 1 }
 0x28a   :  { %384 = vsyncpa [#allocation4], 1 }

</bundles_post_ra>
